<compile_context>
chip_gen: v5e
topology: v5e:2x2
jax: 0.10.0
libtpu: 0.0.40
codegen_flags: <defaults>
</compile_context>

<pallas_src>
import functools
import math

import jax
import jax.numpy as jnp
from jax import lax
from jax.experimental import pallas as pl
from jax.experimental.pallas import tpu as pltpu

BASE_SUBLANES = 8                 # f32 vreg is (8 sublanes x 128 lanes)
NCORES_MAX = 2                    # at most 2 TensorCores per Pallas grid
TARGET_TILE_BYTES = 4 << 20       # ~4 MiB per input per grid step
VMEM_LIMIT_BYTES = 32 * 1024 * 1024


def _num_tensorcores():
    """Best-effort count of TensorCores one Pallas grid can shard across."""
    try:
        info = pltpu.get_tpu_info()
        for attr in ("num_cores", "core_count", "num_tensorcores",
                     "tensorcore_count", "num_cores_per_chip", "cores_per_chip"):
            n = getattr(info, attr, None)
            if n is not None:
                try:
                    n = int(n)
                except (TypeError, ValueError):
                    continue
                if n >= 1:
                    return max(1, min(n, NCORES_MAX))
    except Exception:
        pass
    try:
        kind = jax.devices()[0].device_kind.lower()
    except Exception:
        return 1
    # Dual-TensorCore / megacore generations; single-TC chips (v5e/v6e) -> 1.
    if any(tag in kind for tag in ("v4", "v5p", "v7")):
        return NCORES_MAX
    return 1


def _l1_partial_kernel(x_ref, y_ref, o_ref, *, strips_per_tile, n_strips,
                       n_tiles, tiles_per_core, partial_last, has_oob_tiles):
    """Fold sum(|x-y|) of one (strips_per_tile, sublanes, width) tile into the
    per-core resident (sublanes, width) accumulator block (the kernel output)."""
    c = pl.program_id(0)            # core / outer axis
    i = pl.program_id(1)            # reduction axis (tiles owned by this core)
    t = c * tiles_per_core + i      # unclamped global tile id

    @pl.when(i == 0)
    def _init():
        o_ref[...] = jnp.zeros_like(o_ref)

    x = x_ref[...]
    y = y_ref[...]
    if jnp.issubdtype(x.dtype, jnp.floating):
        # Subtract/abs in the native dtype (halves VPU element ops for bf16 on
        # v6e/v7x), accumulate in f32.
        d = jnp.abs(x - y).astype(jnp.float32)
    else:
        d = jnp.abs(x.astype(jnp.float32) - y.astype(jnp.float32))

    def _accumulate(vals):
        # Pure VPU fold over the strip axis; lanes/sublanes stay intact.
        o_ref[...] += jnp.sum(vals, axis=0)

    if partial_last:
        @pl.when(t < n_tiles - 1)
        def _hot():
            _accumulate(d)

        @pl.when(t == n_tiles - 1)
        def _edge():
            # Last real tile may over-hang the data (garbage in the overhang);
            # zero every strip whose global index is past the real data.
            strip_idx = t * strips_per_tile + lax.broadcasted_iota(
                jnp.int32, (strips_per_tile, 1, 1), 0)
            _accumulate(jnp.where(strip_idx < n_strips, d, 0.0))
        # t >= n_tiles (spill-over duplicate tiles on the last core): no-op.
    elif has_oob_tiles:
        @pl.when(t < n_tiles)
        def _hot():
            _accumulate(d)
    else:
        _accumulate(d)


def _partial_sums(x3, y3, *, n_strips, strips_per_tile, sublanes, width, ncores):
    n_tiles = pl.cdiv(n_strips, strips_per_tile)
    ncores = max(1, min(ncores, n_tiles))
    tiles_per_core = pl.cdiv(n_tiles, ncores)
    partial_last = (n_strips % strips_per_tile) != 0
    has_oob_tiles = (ncores * tiles_per_core) != n_tiles

    kernel = functools.partial(
        _l1_partial_kernel,
        strips_per_tile=strips_per_tile, n_strips=n_strips, n_tiles=n_tiles,
        tiles_per_core=tiles_per_core, partial_last=partial_last,
        has_oob_tiles=has_oob_tiles)

    def in_map(c, i):
        # Clamp so any spill-over tile on the last core re-reads a valid tile;
        # its contribution is skipped/masked inside the kernel.
        return (jnp.minimum(c * tiles_per_core + i, n_tiles - 1), 0, 0)

    in_spec = pl.BlockSpec((strips_per_tile, sublanes, width), in_map)
    out_spec = pl.BlockSpec((sublanes, width), lambda c, i: (c, 0))

    itemsize = x3.dtype.itemsize
    cost = pl.CostEstimate(
        flops=3 * n_strips * sublanes * width,
        transcendentals=0,
        bytes_accessed=2 * n_strips * sublanes * width * itemsize
        + ncores * sublanes * width * 4)

    def _call(dim_semantics):
        return pl.pallas_call(
            kernel,
            out_shape=jax.ShapeDtypeStruct((ncores * sublanes, width),
                                           jnp.float32),
            grid_spec=pltpu.PrefetchScalarGridSpec(
                num_scalar_prefetch=0,
                grid=(ncores, tiles_per_core),
                in_specs=[in_spec, in_spec],
                out_specs=out_spec),
            compiler_params=pltpu.CompilerParams(
                dimension_semantics=dim_semantics,
                vmem_limit_bytes=VMEM_LIMIT_BYTES),
            cost_estimate=cost,
        )(x3, y3)

    if ncores > 1:
        candidates = []
        core_par = getattr(pltpu, "CORE_PARALLEL", None)
        arbitrary = getattr(pltpu, "ARBITRARY", "arbitrary")
        if core_par is not None:
            candidates.append((core_par, arbitrary))    # real per-TC split (v7x)
        candidates.append(("parallel", "arbitrary"))    # megacore fallback
    else:
        candidates = [("arbitrary", "arbitrary")]

    err = None
    for sem in candidates:
        try:
            return _call(sem)
        except Exception as e:  # e.g. CORE_PARALLEL unsupported on this chip
            err = e
    raise err


def l1_loss(x, y, *, ncores=None):
    """sum(|x - y|) / N with N = prod(y.shape); y is 5-D (matches the module)."""
    assert x.shape == y.shape and y.ndim == 5
    n_elems = math.prod(y.shape)
    if ncores is None:
        ncores = _num_tensorcores()

    itemsize = jnp.dtype(x.dtype).itemsize
    pack = max(1, 4 // itemsize)          # 1 for f32, 2 for bf16, 4 for int8/fp8
    sublanes = BASE_SUBLANES * pack       # keep vregs fully packed

    # Widest lane-dense strip whose size divides N -> zero tail (common case);
    # otherwise use width=512 and handle the small ragged tail wrapper-side
    # (no jnp.pad full HBM copy of both inputs).
    width = None
    for w in (512, 256, 128):
        if n_elems % (sublanes * w) == 0:
            width = w
            break
    if width is None:
        width = 512
    strip_elems = sublanes * width

    xf = jnp.ravel(x)
    yf = jnp.ravel(y)
    n_strips = n_elems // strip_elems
    kernel_elems = n_strips * strip_elems
    tail = n_elems - kernel_elems

    if n_strips == 0:
        # TODO(synk): inputs smaller than one (sublanes, width) strip are reduced
        # in plain JAX — too small for a streaming kernel to be worthwhile.
        total = jnp.sum(jnp.abs(xf.astype(jnp.float32) - yf.astype(jnp.float32)))
        return (total / jnp.float32(n_elems)).astype(jnp.float32)

    if tail:
        # Ragged N: kernel covers the largest strip-aligned prefix.  (The prefix
        # slice may materialize a copy; still preferable to padding both inputs.)
        xk = lax.slice(xf, (0,), (kernel_elems,))
        yk = lax.slice(yf, (0,), (kernel_elems,))
    else:
        xk, yk = xf, yf                  # free reshape; zero extra HBM traffic
    x3 = xk.reshape(n_strips, sublanes, width)
    y3 = yk.reshape(n_strips, sublanes, width)

    strip_bytes = strip_elems * itemsize
    strips_per_tile = int(max(1, min(TARGET_TILE_BYTES // strip_bytes, n_strips)))

    partials = _partial_sums(
        x3, y3, n_strips=n_strips, strips_per_tile=strips_per_tile,
        sublanes=sublanes, width=width, ncores=ncores)

    # Single cross-lane/sublane reduction + mean, once, outside the grid loop.
    total = jnp.sum(partials, dtype=jnp.float32)
    if tail:
        xt = lax.slice(xf, (kernel_elems,), (n_elems,))
        yt = lax.slice(yf, (kernel_elems,), (n_elems,))
        total = total + jnp.sum(
            jnp.abs(xt.astype(jnp.float32) - yt.astype(jnp.float32)))
    return (total / jnp.float32(n_elems)).astype(jnp.float32)


if __name__ == "__main__":
    key = jax.random.PRNGKey(0)
    kx, ky = jax.random.split(key)
    # Small 5-D shape consistent with a 3-D VAE-style tensor [B, C, D, H, W].
    shape = (2, 4, 4, 8, 16)
    x = jax.random.normal(kx, shape, dtype=jnp.float32)
    y = jax.random.normal(ky, shape, dtype=jnp.float32)

    out = jax.block_until_ready(l1_loss(x, y))

    # Reference check in plain JAX (same semantics as the PyTorch module).
    ref = jnp.sum(jnp.abs(x - y)) / math.prod(shape)
    assert jnp.allclose(out, ref, rtol=1e-5, atol=1e-5), (out, ref)

    print("KERNEL_OK")
</pallas_src>

<mosaic_0001>
module attributes {stable_mosaic.version = 11 : i64} {
  func.func @_l1_partial_kernel(%arg0: i32, %arg1: i32, %arg2: memref<1x8x512xf32, #tpu.memory_space<vmem>>, %arg3: memref<1x8x512xf32, #tpu.memory_space<vmem>>, %arg4: memref<8x512xf32, #tpu.memory_space<vmem>>) attributes {dimension_semantics = [#tpu.dimension_semantics<arbitrary>, #tpu.dimension_semantics<arbitrary>], iteration_bounds = array<i64: 1, 1>, scalar_prefetch = 0 : i64, scratch_operands = 0 : i64, tpu.core_type = #tpu.core_type<tc>, window_params = [{transform_indices = @transform_0, window_bounds = array<i64: 1, 8, 512>}, {transform_indices = @transform_1, window_bounds = array<i64: 1, 8, 512>}, {transform_indices = @transform_2, window_bounds = array<i64: 8, 512>}]} {
    %c0_i32 = arith.constant 0 : i32
    %0 = arith.cmpi eq, %arg1, %c0_i32 : i32
    %1 = arith.extui %0 : i1 to i32
    %c0_i32_0 = arith.constant 0 : i32
    %2 = arith.cmpi ne, %1, %c0_i32_0 : i32
    scf.if %2 {
      %cst_10 = arith.constant 0.000000e+00 : f32
      %11 = vector.broadcast %cst_10 : f32 to vector<8x512xf32>
      %c0_11 = arith.constant 0 : index
      %c0_12 = arith.constant 0 : index
      %12 = vector.load %arg4[%c0_11, %c0_12] : memref<8x512xf32, #tpu.memory_space<vmem>>, vector<8x512xf32>
      tpu.vector_store %arg4[%c0_11, %c0_12], %11 {strides = array<i32>} : memref<8x512xf32, #tpu.memory_space<vmem>>, vector<8x512xf32>,
    } else {
    }
    %c0 = arith.constant 0 : index
    %c0_1 = arith.constant 0 : index
    %c0_2 = arith.constant 0 : index
    %3 = vector.load %arg2[%c0, %c0_1, %c0_2] : memref<1x8x512xf32, #tpu.memory_space<vmem>>, vector<1x8x512xf32>
    %c0_3 = arith.constant 0 : index
    %c0_4 = arith.constant 0 : index
    %c0_5 = arith.constant 0 : index
    %4 = vector.load %arg3[%c0_3, %c0_4, %c0_5] : memref<1x8x512xf32, #tpu.memory_space<vmem>>, vector<1x8x512xf32>
    %5 = arith.subf %3, %4 : vector<1x8x512xf32>
    %6 = math.absf %5 : vector<1x8x512xf32>
    %c0_6 = arith.constant 0 : index
    %c0_7 = arith.constant 0 : index
    %7 = vector.load %arg4[%c0_6, %c0_7] : memref<8x512xf32, #tpu.memory_space<vmem>>, vector<8x512xf32>
    %cst = arith.constant dense<0.000000e+00> : vector<8x512xf32>
    %8 = vector.multi_reduction <add>, %6, %cst [0] : vector<1x8x512xf32> to vector<8x512xf32>
    %9 = arith.addf %7, %8 : vector<8x512xf32>
    %c0_8 = arith.constant 0 : index
    %c0_9 = arith.constant 0 : index
    %10 = vector.load %arg4[%c0_8, %c0_9] : memref<8x512xf32, #tpu.memory_space<vmem>>, vector<8x512xf32>
    tpu.vector_store %arg4[%c0_8, %c0_9], %9 {strides = array<i32>} : memref<8x512xf32, #tpu.memory_space<vmem>>, vector<8x512xf32>,
    return
  }
  func.func @transform_0(%arg0: i32, %arg1: i32) -> (i32, i32, i32) {
    %c1_i32 = arith.constant 1 : i32
    %0 = arith.muli %arg0, %c1_i32 : i32
    %1 = arith.addi %0, %arg1 : i32
    %c0_i32 = arith.constant 0 : i32
    %2 = arith.minsi %1, %c0_i32 : i32
    %c0_i32_0 = arith.constant 0 : i32
    %c0_i32_1 = arith.constant 0 : i32
    %c0_i32_2 = arith.constant 0 : i32
    return %2, %c0_i32_0, %c0_i32_1 : i32, i32, i32
  }
  func.func @transform_1(%arg0: i32, %arg1: i32) -> (i32, i32, i32) {
    %c1_i32 = arith.constant 1 : i32
    %0 = arith.muli %arg0, %c1_i32 : i32
    %1 = arith.addi %0, %arg1 : i32
    %c0_i32 = arith.constant 0 : i32
    %2 = arith.minsi %1, %c0_i32 : i32
    %c0_i32_0 = arith.constant 0 : i32
    %c0_i32_1 = arith.constant 0 : i32
    %c0_i32_2 = arith.constant 0 : i32
    return %2, %c0_i32_0, %c0_i32_1 : i32, i32, i32
  }
  func.func @transform_2(%arg0: i32, %arg1: i32) -> (i32, i32) {
    %c0_i32 = arith.constant 0 : i32
    %c0_i32_0 = arith.constant 0 : i32
    return %arg0, %c0_i32 : i32, i32
  }
}

</mosaic_0001>

<bundles_post_ra>
// kernel: tpu_custom_call.1
= control target key start
LH: loop header
LB: loop body
LE: loop exit
PB: predicated region body
PF: predicated region fallthrough
CT: control target
= control target key end

     0   :  { %7 = vsyncpa [#allocation3], 0  ;;  %s229_s0 = inlined_call_operand.hbm [shape: f32[1,8,512], index: 0, kind: input, shape index: {}]   ;;  %s230_s1 = inlined_call_operand.hbm [shape: f32[1,8,512], index: 1, kind: input, shape index: {}]   ;;  %s231_s2 = inlined_call_operand.hbm [shape: f32[8,512], index: 2, kind: output, shape index: {}]  }
   0x1   :  { %8 = vsyncpa [#allocation6], 0 }
   0x2   :  { %9 = vsyncpa [#allocation4], 0  ;;  %s21_s11 = sshll.u32 %s229_s0, 4  ;;  %s202_s12 = smov [#allocation2]   ;;  %s22_s11 = int_to_ptr.hbm [resolvable:$true] %s21_s11 }
   0x3   :  { %s23_s13 = sshll.u32 %s202_s12, 4  ;;  %s38_s16 = sshll.u32 %s230_s1, 4  ;;  %s24_s13 = int_to_ptr.vmem [resolvable:$true] %s23_s13  ;;  %s39_s16 = int_to_ptr.hbm [resolvable:$true] %s38_s16 }
   0x4   :  { %26 = dma.hbm_to_vmem [thread:$0]  %s22_s11, 512, %s24_s13, [#allocation3]  }
   0x5   :  { %s203_s17 = smov [#allocation5]  }
   0x6   :  { %s40_s18 = sshll.u32 %s203_s17, 4  ;;  %s41_s18 = int_to_ptr.vmem [resolvable:$true] %s40_s18 }
   0x7   :  { %43 = dma.hbm_to_vmem [thread:$0]  %s39_s16, 512, %s41_s18, [#allocation6]  }
   0x8   :  { %196 = dma.done.wait [#allocation3], 512  }
   0x9   :  { %197 = vsyncadd [#allocation3], 4294966784 }
   0xa   :  { %198 = dma.done.wait [#allocation6], 512  }
   0xb   :  { %199 = vsyncadd [#allocation6], 4294966784  ;;  %v66_v0 = vld [vmem:[#allocation2] sm:$0xff]  ;;  %v67_v2 = vld [vmem:[#allocation2 + $0x8] sm:$0xff]  ;;  %s204_s0 = smov [#allocation7]   ;;  %s105_s21 = sshll.u32 %s231_s2, 4  ;;  %s106_s21 = int_to_ptr.hbm [resolvable:$true] %s105_s21 }
   0xc   :  { %v70_v1 = vld [vmem:[#allocation5] sm:$0xff]  ;;  %v71_v4 = vld [vmem:[#allocation5 + $0x8] sm:$0xff]  ;;  %v68_v5 = vld [vmem:[#allocation2 + $0x10] sm:$0xff]  ;;  %s103_s1 = sshll.u32 %s204_s0, 4  ;;  %s104_s1 = int_to_ptr.vmem [resolvable:$true] %s103_s1 }
   0xd   :  { %v74_v3 = vsub.f32 %v66_v0, %v70_v1  ;;  %v72_v6 = vld [vmem:[#allocation5 + $0x10] sm:$0xff]  ;;  %v75_v7 = vsub.f32 %v67_v2, %v71_v4  ;;  %v69_v9 = vld [vmem:[#allocation2 + $0x18] sm:$0xff] }
   0xe   :  { %v76_v8 = vsub.f32 %v68_v5, %v72_v6  ;;  %v73_v10 = vld [vmem:[#allocation5 + $0x18] sm:$0xff] }
   0xf   :  { %v78_v11 = vand.u32 2147483647, %v74_v3  ;;  %v77_v12 = vsub.f32 %v69_v9, %v73_v10  ;;  %v79_v13 = vand.u32 2147483647, %v75_v7 }
  0x10   :  { %v80_v14 = vand.u32 2147483647, %v76_v8 }
  0x11   :  { %v81_v15 = vand.u32 2147483647, %v77_v12  ;;  %94 = vst [vmem:[#allocation7] sm:$0xff] %v78_v11 }
  0x12   :  { %95 = vst [vmem:[#allocation7 + $0x8] sm:$0xff] %v79_v13 }
  0x13   :  { %96 = vst [vmem:[#allocation7 + $0x10] sm:$0xff] %v80_v14 }
  0x14   :  { %97 = vst [vmem:[#allocation7 + $0x18] sm:$0xff] %v81_v15 }
  0x15   :  { %108 = dma.vmem_to_hbm [thread:$0]  %s104_s1, 512, %s106_s21, [#allocation4]  }
  0x16   :  { %200 = dma.done.wait [#allocation4], 512  }
  0x17   :  { %201 = vsyncadd [#allocation4], 4294966784 }
  0x18   :  { %113 = vsyncpa [#allocation3], 1 }
  0x19   :  { %114 = vsyncpa [#allocation6], 1 }
  0x1a   :  { %115 = vsyncpa [#allocation4], 1 }

</bundles_post_ra>
